<compile_context>
chip_gen: v5e
topology: v5e:2x2
jax: 0.10.0
libtpu: 0.0.40
codegen_flags: <defaults>
</compile_context>

<pallas_src>
import functools

import jax
import jax.numpy as jnp
from jax import lax
from jax.experimental import pallas as pl
from jax.experimental.pallas import tpu as pltpu


def _round_up(n, m):
    return ((n + m - 1) // m) * m


# --------------------------------------------------------------------------
# Pre-pass: row-wise L2 normalization (+ optional folded scale), f32 -> bf16.
# --------------------------------------------------------------------------
def _normalize_rows_kernel(v_ref, o_ref, *, scale):
    v = v_ref[...].astype(jnp.float32)
    norm = jnp.sqrt(jnp.sum(v * v, axis=1, keepdims=True))
    inv = pl.reciprocal(norm + 1e-5, approx=True)      # EUP slot (free-ish)
    o_ref[...] = (v * (scale * inv)).astype(o_ref.dtype)


def _normalize_rows(arr, rows_padded, tr, scale, out_dtype):
    """Row-normalize `arr` ([rows, feat]) into a padded [rows_padded, feat]
    bf16 buffer.  Boundary blocks are partial (no wrapper-side jnp.pad)."""
    rows, feat = arr.shape
    kernel = functools.partial(_normalize_rows_kernel, scale=float(scale))
    return pl.pallas_call(
        kernel,
        out_shape=jax.ShapeDtypeStruct((rows_padded, feat), out_dtype),
        grid_spec=pltpu.PrefetchScalarGridSpec(
            num_scalar_prefetch=0,
            grid=(rows_padded // tr,),
            in_specs=[pl.BlockSpec((tr, feat), lambda i: (i, 0))],
            out_specs=pl.BlockSpec((tr, feat), lambda i: (i, 0)),
        ),
        compiler_params=pltpu.CompilerParams(
            dimension_semantics=("parallel",),
            vmem_limit_bytes=48 * 1024 * 1024),
    )(arr)


# --------------------------------------------------------------------------
# Main kernel: scores = x_n @ w_n^T  (scale already folded into x_n).
# Pure MXU work; f32 accumulator carried across the K axis.
# --------------------------------------------------------------------------
def _dist_matmul_kernel(x_ref, w_ref, o_ref, acc_ref):
    @pl.when(pl.program_id(2) == 0)
    def _():
        acc_ref[...] = jnp.zeros_like(acc_ref)

    # Contract the shared feature axis of both operands (x @ w^T) without
    # materializing a transpose of the weight tile.
    acc_ref[...] += lax.dot_general(
        x_ref[...], w_ref[...],
        dimension_numbers=(((1,), (1,)), ((), ())),
        preferred_element_type=jnp.float32)

    @pl.when(pl.program_id(2) == pl.num_programs(2) - 1)
    def _():
        o_ref[...] = acc_ref[...].astype(o_ref.dtype)


def dist_linear(x, weight, scale_factor=30.0, *, tb=512, tn=512, tk_max=1024,
                mxu_dtype=jnp.bfloat16, out_dtype=jnp.float32):
    """Forward pass of distLinear.

    x:      [B, indim] features
    weight: [outdim, indim] classifier weights
    returns [B, outdim] scores = scale_factor * cos(x, w)
    """
    B, indim = x.shape
    outdim, indim_w = weight.shape
    assert indim == indim_w, (indim, indim_w)

    # ---- tile sizes satisfying the (8, 128) layout constraints -------------
    tb = _round_up(min(tb, _round_up(B, 8)), 8)          # sublane-aligned
    Bp = _round_up(B, tb)
    tn = _round_up(min(tn, _round_up(outdim, 128)), 128)  # lane-dense output
    Np = _round_up(outdim, tn)

    # K tile: largest multiple of 128 that divides indim and is <= tk_max;
    # otherwise a single full-feature step (e.g. small / unaligned indim).
    if indim % 128 == 0 and indim > tk_max:
        divisors = [d for d in range(128, tk_max + 1, 128) if indim % d == 0]
        tk = max(divisors) if divisors else indim
    else:
        tk = indim
    nk = indim // tk

    # ---- one-shot normalization pre-passes (bf16, padded, scale folded) ----
    x_n = _normalize_rows(x, Bp, tb, scale_factor, mxu_dtype)
    w_n = _normalize_rows(weight, Np, tn, 1.0, mxu_dtype)

    # ---- main tiled matmul: (batch tiles) x (class tiles) x (K tiles) ------
    # NOTE: j (classes) is innermost of the parallel axes, so the weight
    # streams per batch tile; for B >> outdim consider swapping i/j so the
    # resident normalized weight is re-used and x streams once.
    out = pl.pallas_call(
        _dist_matmul_kernel,
        out_shape=jax.ShapeDtypeStruct((Bp, Np), out_dtype),
        grid_spec=pltpu.PrefetchScalarGridSpec(
            num_scalar_prefetch=0,
            grid=(Bp // tb, Np // tn, nk),
            in_specs=[
                pl.BlockSpec((tb, tk), lambda i, j, k: (i, k)),
                pl.BlockSpec((tn, tk), lambda i, j, k: (j, k)),
            ],
            out_specs=pl.BlockSpec((tb, tn), lambda i, j, k: (i, j)),
            scratch_shapes=[pltpu.VMEM((tb, tn), jnp.float32)],
        ),
        compiler_params=pltpu.CompilerParams(
            dimension_semantics=("parallel", "parallel", "arbitrary"),
            vmem_limit_bytes=48 * 1024 * 1024),
    )(x_n, w_n)

    return out[:B, :outdim]


def dist_linear_ref(x, weight, scale_factor=30.0):
    x_norm = jnp.linalg.norm(x, axis=1, keepdims=True)
    x_n = x / (x_norm + 1e-5)
    w_norm = jnp.linalg.norm(weight, axis=1, keepdims=True)
    w_n = weight / (w_norm + 1e-5)
    return scale_factor * (x_n @ w_n.T)


if __name__ == "__main__":
    # Small shapes consistent with the module: batch=8, indim=32, outdim=16.
    B, indim, outdim = 8, 32, 16
    key = jax.random.PRNGKey(0)
    kx, kw = jax.random.split(key)

    x = jax.random.normal(kx, (B, indim), dtype=jnp.float32)
    # Deterministic synthetic init for nn.Linear(indim, outdim, bias=False):
    # weight shape is [outdim, indim].
    weight = jax.random.normal(kw, (outdim, indim), dtype=jnp.float32) * 0.1

    out = dist_linear(x, weight, scale_factor=30.0)
    out = jax.block_until_ready(out)

    ref = dist_linear_ref(x, weight, scale_factor=30.0)
    assert out.shape == (B, outdim)
    # bf16 MXU operands + approx reciprocal in both pre-passes => loose tol.
    assert jnp.allclose(out, ref, atol=0.3, rtol=2e-2), (
        f"max err {jnp.max(jnp.abs(out - ref))}")

    print("KERNEL_OK")
</pallas_src>

<mosaic_0001>
module attributes {stable_mosaic.version = 11 : i64} {
  func.func @_normalize_rows_kernel(%arg0: i32, %arg1: memref<8x32xf32, #tpu.memory_space<vmem>>, %arg2: memref<8x32xbf16, #tpu.memory_space<vmem>>) attributes {dimension_semantics = [#tpu.dimension_semantics<parallel>], iteration_bounds = array<i64: 1>, scalar_prefetch = 0 : i64, scratch_operands = 0 : i64, tpu.core_type = #tpu.core_type<tc>, window_params = [{transform_indices = @transform_0, window_bounds = array<i64: 8, 32>}, {transform_indices = @transform_1, window_bounds = array<i64: 8, 32>}]} {
    %c0 = arith.constant 0 : index
    %c0_0 = arith.constant 0 : index
    %0 = vector.load %arg1[%c0, %c0_0] : memref<8x32xf32, #tpu.memory_space<vmem>>, vector<8x32xf32>
    %1 = arith.mulf %0, %0 : vector<8x32xf32>
    %cst = arith.constant dense<0.000000e+00> : vector<8xf32>
    %2 = vector.multi_reduction <add>, %1, %cst [1] : vector<8x32xf32> to vector<8xf32>
    %3 = vector.shape_cast %2 : vector<8xf32> to vector<8x1xf32>
    %4 = math.sqrt %3 : vector<8x1xf32>
    %cst_1 = arith.constant 9.99999974E-6 : f32
    %5 = vector.broadcast %cst_1 : f32 to vector<8x1xf32>
    %6 = arith.addf %4, %5 : vector<8x1xf32>
    %7 = tpu.reciprocal %6 {approx = true} : vector<8x1xf32> -> vector<8x1xf32>
    %cst_2 = arith.constant 3.000000e+01 : f32
    %8 = vector.broadcast %cst_2 : f32 to vector<8x1xf32>
    %9 = arith.mulf %8, %7 : vector<8x1xf32>
    %10 = vector.broadcast %9 : vector<8x1xf32> to vector<8x32xf32>
    %11 = arith.mulf %0, %10 : vector<8x32xf32>
    %12 = arith.truncf %11 : vector<8x32xf32> to vector<8x32xbf16>
    %c0_3 = arith.constant 0 : index
    %c0_4 = arith.constant 0 : index
    %13 = vector.load %arg2[%c0_3, %c0_4] : memref<8x32xbf16, #tpu.memory_space<vmem>>, vector<8x32xbf16>
    tpu.vector_store %arg2[%c0_3, %c0_4], %12 {strides = array<i32>} : memref<8x32xbf16, #tpu.memory_space<vmem>>, vector<8x32xbf16>,
    return
  }
  func.func @transform_0(%arg0: i32) -> (i32, i32) {
    %c0_i32 = arith.constant 0 : i32
    %c0_i32_0 = arith.constant 0 : i32
    return %arg0, %c0_i32 : i32, i32
  }
  func.func @transform_1(%arg0: i32) -> (i32, i32) {
    %c0_i32 = arith.constant 0 : i32
    %c0_i32_0 = arith.constant 0 : i32
    return %arg0, %c0_i32 : i32, i32
  }
}

</mosaic_0001>

<bundles_post_ra>
// kernel: tpu_custom_call.1
= control target key start
LH: loop header
LB: loop body
LE: loop exit
PB: predicated region body
PF: predicated region fallthrough
CT: control target
= control target key end

     0   :  { %6 = vsyncpa [#allocation3], 0  ;;  %s141_s0 = inlined_call_operand.hbm [shape: f32[8,32], index: 0, kind: input, shape index: {}]   ;;  %s142_s1 = inlined_call_operand.hbm [shape: bf16[8,32], index: 1, kind: output, shape index: {}]  }
   0x1   :  { %7 = vsyncpa [#allocation4], 0  ;;  %s13_s8 = sshll.u32 %s141_s0, 4  ;;  %s123_s9 = smov [#allocation2]   ;;  %s14_s8 = int_to_ptr.hbm [resolvable:$true] %s13_s8 }
   0x2   :  { %s15_s10 = sshll.u32 %s123_s9, 4  ;;  %s16_s10 = int_to_ptr.vmem [resolvable:$true] %s15_s10 }
   0x3   :  { %18 = dma.hbm_to_vmem [thread:$0]  %s14_s8, 128, %s16_s10, [#allocation3]  }
   0x4   :  { %119 = dma.done.wait [#allocation3], 128  }
   0x5   :  { %120 = vsyncadd [#allocation3], 4294967168  ;;  %v23_v0 = vld [vmem:[#allocation2] sm:$0xff]  ;;  %vm25_vm0 = vcmask 261120   ;;  %s124_s0 = smov [#allocation5]   ;;  %s55_s14 = sshll.u32 %s142_s1, 4  ;;  %s56_s14 = int_to_ptr.hbm [resolvable:$true] %s55_s14 }
   0x6   :  { %v24_v1 = vmul.f32 %v23_v0, %v23_v0  ;;  %s53_s11 = sshll.u32 %s124_s0, 4  ;;  %vm46_vm3 = vcmask 257024   ;;  %s54_s11 = int_to_ptr.vmem [resolvable:$true] %s53_s11 }
   0x8   :  { %v26_v2 = vsel %vm25_vm0, %v24_v1, 0.0 }
   0x9   :  { %27 = vadd.xlane.f32.xlu0 %v26_v2 }
  0x7c   :  { %v28_v3 = vpop.xlane.xlu0 %27 }
  0x7d   :  { %67 = vrsqrt.f32 %v28_v3  ;;  %vm36_vm1 = vcmp.eq.f32.partialorder %v28_v3, inf  ;;  %v39_v11 = vand.u32 2147483648, %v28_v3  ;;  %vm38_vm2 = vcmp.eq.f32.partialorder %v28_v3, 0.0 }
  0x83   :  { %v68_v4 = vpop.eup %67 }
  0x84   :  { %v30_v5 = vmul.f32 %v68_v4, %v28_v3 }
  0x86   :  { %v31_v6 = vmul.f32 %v68_v4, %v30_v5 }
  0x88   :  { %v32_v7 = vmul.f32 0.5, %v31_v6 }
  0x8a   :  { %v33_v8 = vsub.f32 1.5, %v32_v7 }
  0x8c   :  { %v34_v9 = vmul.f32 %v68_v4, %v33_v8 }
  0x8e   :  { %v35_v10 = vmul.f32 %v34_v9, %v28_v3 }
  0x90   :  { %v37_v12 = vsel %vm36_vm1, %v28_v3, %v35_v10 }
  0x91   :  { %v40_v13 = vsel %vm38_vm2, %v39_v11, %v37_v12 }
  0x92   :  { %v41_v14 = vadd.f32 1e-05, %v40_v13 }
  0x94   :  { %69 = vrcp.f32 %v41_v14 }
  0x9a   :  { %v70_v15 = vpop.eup %69 }
  0x9b   :  { %v43_v16 = vmul.f32 30.0, %v70_v15 }
  0x9d   :  { %v44_v17 = vmul.f32 %v43_v16, %v23_v0 }
  0x9f   :  { %v45_v18 = vpack.c.bf16 %v44_v17, %v44_v17 }
  0xa1   :  { %47 = vst.msk [vmem:[#allocation5] sm:$0xf] %vm46_vm3, %v45_v18 }
  0xa2   :  { %58 = dma.vmem_to_hbm [thread:$0]  %s54_s11, 64, %s56_s14, [#allocation4]  }
  0xa3   :  { %121 = dma.done.wait [#allocation4], 64  }
  0xa4   :  { %122 = vsyncadd [#allocation4], 4294967232 }
  0xa5   :  { %63 = vsyncpa [#allocation3], 1 }
  0xa6   :  { %64 = vsyncpa [#allocation4], 1 }

</bundles_post_ra>
